<compile_context>
chip_gen: v7x
topology: tpu7x:2x2x1
jax: 0.10.0
libtpu: 0.0.40
codegen_flags: <defaults>
</compile_context>

<pallas_src>
import functools

import jax
import jax.numpy as jnp
from jax import lax
from jax.experimental import pallas as pl
from jax.experimental.pallas import tpu as pltpu


# ---------------------------------------------------------------------------
# Kernels: tiled linear projection  y = x @ W (+ b), N (output) dimension tiled
# ---------------------------------------------------------------------------
def _linear_bias_kernel(x_ref, w_ref, b_ref, o_ref):
    # x_ref: (1, tt, d_in), w_ref: (d_in, tn), b_ref: (1, tn), o_ref: (1, tt, tn)
    y = jnp.dot(x_ref[0], w_ref[...], preferred_element_type=jnp.float32)
    o_ref[0] = (y + b_ref[...]).astype(o_ref.dtype)


def _linear_nobias_kernel(x_ref, w_ref, o_ref):
    # No bias DMA / VPU add for the QKV projection (qkv_bias=False).
    o_ref[0] = jnp.dot(x_ref[0], w_ref[...],
                       preferred_element_type=jnp.float32).astype(o_ref.dtype)


def _linear(x, w, b=None, *, block_t=256, block_n=512, out_dtype=None,
            vmem_limit_bytes=None):
    """y = x @ w (+ b).  x: (B, T, d_in), w: (d_in, n_out), b: (1, n_out) or None."""
    B, T, d_in = x.shape
    n_out = w.shape[1]
    tt = min(block_t, T)
    tn = min(block_n, n_out)
    assert T % tt == 0, "sequence length must be divisible by the token tile"
    assert n_out % tn == 0, "output width must be divisible by the n tile"
    out_dtype = x.dtype if out_dtype is None else out_dtype
    # TODO(synk): for very large d_in add a k-reduction grid axis with an f32 VMEM
    # accumulator (pl.when init/finalize) instead of keeping the full d_in in one block.

    params = dict(dimension_semantics=("parallel", "parallel", "parallel"))
    if vmem_limit_bytes is not None:
        params["vmem_limit_bytes"] = vmem_limit_bytes

    in_specs = [
        pl.BlockSpec((1, tt, d_in), lambda b_, t_, n_: (b_, t_, 0)),
        # Weight streams in (d_in, tn) blocks -> stays inside scoped VMEM at any d_out.
        pl.BlockSpec((d_in, tn), lambda b_, t_, n_: (0, n_)),
    ]
    args = [x, w]
    if b is not None:
        in_specs.append(pl.BlockSpec((1, tn), lambda b_, t_, n_: (0, n_)))
        args.append(b)
        kernel = _linear_bias_kernel
    else:
        kernel = _linear_nobias_kernel

    return pl.pallas_call(
        kernel,
        out_shape=jax.ShapeDtypeStruct((B, T, n_out), out_dtype),
        grid=(B, T // tt, n_out // tn),
        in_specs=in_specs,
        out_specs=pl.BlockSpec((1, tt, tn), lambda b_, t_, n_: (b_, t_, n_)),
        compiler_params=pltpu.CompilerParams(**params),
    )(*args)


# ---------------------------------------------------------------------------
# Kernel: flash-style causal attention over (batch, q-tile, kv-tile) grid
#   q/k/v: (B, H, T, hd)  ->  out: (B, T, H*hd)   (heads merged in-kernel)
# ---------------------------------------------------------------------------
def _flash_kernel(q_ref, k_ref, v_ref, o_ref, m_sc, l_sc, acc_sc,
                  *, block_q, block_k, approx_recip):
    qi = pl.program_id(1)
    ki = pl.program_id(2)

    @pl.when(ki == 0)
    def _init():
        m_sc[...] = jnp.full(m_sc.shape, -jnp.inf, m_sc.dtype)
        l_sc[...] = jnp.zeros(l_sc.shape, l_sc.dtype)
        acc_sc[...] = jnp.zeros(acc_sc.shape, acc_sc.dtype)

    q_start = qi * block_q
    k_start = ki * block_k

    def _scores():
        # Head-batched score matmul; contract last axes so no explicit k transpose.
        # 1/sqrt(hd) is already folded into Wq, so no per-step rescale of q.
        return jnp.einsum("hqd,hkd->hqk", q_ref[0], k_ref[0],
                          preferred_element_type=jnp.float32)   # (H, tq, tk) f32

    def _tile_update(s):
        m_new = jnp.maximum(m_sc[...], jnp.max(s, axis=-1, keepdims=True))  # (H, tq, 1)
        alpha = jnp.exp(m_sc[...] - m_new)
        p = jnp.exp(s - m_new)                                   # unnormalized probs
        l_sc[...] = alpha * l_sc[...] + jnp.sum(p, axis=-1, keepdims=True)
        acc_sc[...] = alpha * acc_sc[...] + jnp.einsum(
            "hqk,hkd->hqd", p.astype(v_ref.dtype), v_ref[0],
            preferred_element_type=jnp.float32)                  # (H, tq, hd) f32
        m_sc[...] = m_new

    # Fully-below-diagonal tiles: no iota/compare/select at all.
    @pl.when(k_start + block_k - 1 <= q_start)
    def _full_tile():
        _tile_update(_scores())

    # Diagonal-straddling tiles: build & apply the causal mask.
    # (Tiles strictly above the diagonal are skipped entirely; their K/V DMA is also
    #  elided via the clamped kv index_map below.)
    @pl.when(jnp.logical_and(k_start + block_k - 1 > q_start,
                             k_start <= q_start + block_q - 1))
    def _diag_tile():
        s = _scores()
        row = q_start + lax.broadcasted_iota(jnp.int32, (block_q, block_k), 0)
        col = k_start + lax.broadcasted_iota(jnp.int32, (block_q, block_k), 1)
        # Large finite negative is safe: the ki=0 tile always has an unmasked column
        # (col 0) for every row, so m never stays at -1e30.
        s = jnp.where((col > row)[None, :, :], jnp.float32(-1e30), s)
        _tile_update(s)

    @pl.when(ki == pl.num_programs(2) - 1)
    def _finalize():
        # Deferred softmax normalization (one reciprocal per q tile), then merge heads
        # in-kernel so the output block is lane-dense (tq, H*hd) and the wrapper needs
        # no ctx transpose / HBM round trip.
        inv_l = pl.reciprocal(l_sc[...], approx=approx_recip)
        ctx = acc_sc[...] * inv_l                                # (H, tq, hd) f32
        H, tq, hd = ctx.shape
        ctx = jnp.transpose(ctx, (1, 0, 2)).reshape(tq, H * hd)  # once per q tile
        o_ref[0] = ctx.astype(o_ref.dtype)


def _flash_attention(q, k, v, *, block_q=256, block_k=256, approx_recip=False,
                     out_dtype=None, vmem_limit_bytes=None):
    B, H, T, hd = q.shape
    d_out = H * hd
    tq = min(block_q, T)
    tk = min(block_k, T)
    assert T % tq == 0 and T % tk == 0, "T must be divisible by the q/kv tiles"
    out_dtype = q.dtype if out_dtype is None else out_dtype
    # TODO(synk): ragged / non-divisible sequence lengths not handled (no padding path).
    # TODO(synk): on v7x (64 MiB VMEM) split H into a grid axis for large H*tq blocks.

    kernel = functools.partial(_flash_kernel, block_q=tq, block_k=tk,
                               approx_recip=approx_recip)
    params = dict(dimension_semantics=("parallel", "parallel", "arbitrary"))
    if vmem_limit_bytes is not None:
        params["vmem_limit_bytes"] = vmem_limit_bytes

    def kv_index(b, i, j):
        # Clamp the kv block index to the last causally-needed block for this q tile:
        # steps above the diagonal repeat the previous block index -> DMA elided
        # (compute for those steps is already skipped inside the kernel).
        return (b, 0, jnp.minimum(j, (i * tq + tq - 1) // tk), 0)

    return pl.pallas_call(
        kernel,
        out_shape=jax.ShapeDtypeStruct((B, T, d_out), out_dtype),
        grid=(B, T // tq, T // tk),
        in_specs=[
            pl.BlockSpec((1, H, tq, hd), lambda b, i, j: (b, 0, i, 0)),
            pl.BlockSpec((1, H, tk, hd), kv_index),
            pl.BlockSpec((1, H, tk, hd), kv_index),
        ],
        # Lane-dense (tq, d_out) output block, constant over the kv axis (written once
        # in the finalize step of each q tile).
        out_specs=pl.BlockSpec((1, tq, d_out), lambda b, i, j: (b, i, 0)),
        scratch_shapes=[
            pltpu.VMEM((H, tq, 1), jnp.float32),    # running max
            pltpu.VMEM((H, tq, 1), jnp.float32),    # running denominator
            pltpu.VMEM((H, tq, hd), jnp.float32),   # unnormalized context accumulator
        ],
        compiler_params=pltpu.CompilerParams(**params),
    )(q, k, v)


# ---------------------------------------------------------------------------
# Wrapper: full MultiHeadAttention forward
# ---------------------------------------------------------------------------
def multi_head_attention(x, wq, wk, wv, wo, bo, *, num_heads,
                         compute_dtype=jnp.bfloat16, approx_recip=False,
                         block_q=256, block_k=256, block_t=256, block_n=512,
                         vmem_limit_bytes=None):
    """x: (B, T, d_in); wq/wk/wv: (d_in, d_out); wo: (d_out, d_out); bo: (1, d_out).

    compute_dtype: MXU input dtype (bf16 default = peak rate on all TPU generations;
    accumulation / softmax stats stay f32). Pass jnp.float32 for a tight-precision path,
    or None to use x.dtype. On v5e prefer block_q=128; on v6e/v7x 256 fills the MXU.
    """
    B, T, d_in = x.shape
    d_out = wq.shape[1]
    assert d_out % num_heads == 0, "d_out must be divisible by num_heads"
    hd = d_out // num_heads
    cdt = x.dtype if compute_dtype is None else compute_dtype
    scale = 1.0 / float(hd) ** 0.5

    xc = x.astype(cdt)
    # Fold 1/sqrt(hd) into Wq (scores = (x@(Wq*s)) @ K^T == (Q@K^T)*s), so the flash
    # kernel never rescales q. qkv_bias=False -> no bias path in the QKV projection.
    w_qkv = jnp.concatenate([wq * scale, wk, wv], axis=1).astype(cdt)   # (d_in, 3*d_out)

    # 1) fused QKV projection (N-tiled weight, no bias)
    qkv = _linear(xc, w_qkv, None, block_t=block_t, block_n=block_n,
                  out_dtype=cdt, vmem_limit_bytes=vmem_limit_bytes)     # (B, T, 3*d_out)

    # Wrapper-side head split (XLA layout plumbing).
    # TODO(synk): when hd is a multiple of 128 (or heads become a grid axis) read heads
    # directly from qkv via index_map offsets and drop this split/transpose round trip.
    q, k, v = jnp.split(qkv, 3, axis=-1)
    to_heads = lambda t: t.reshape(B, T, num_heads, hd).transpose(0, 2, 1, 3)
    qh, kh, vh = to_heads(q), to_heads(k), to_heads(v)

    # 2) flash attention with online softmax; heads merged in-kernel -> (B, T, d_out)
    ctx = _flash_attention(qh, kh, vh, block_q=block_q, block_k=block_k,
                           approx_recip=approx_recip, out_dtype=cdt,
                           vmem_limit_bytes=vmem_limit_bytes)           # (B, T, d_out)

    # 3) output projection: ctx @ Wo + bo
    out = _linear(ctx, wo.astype(cdt), bo.astype(jnp.float32),
                  block_t=block_t, block_n=block_n, out_dtype=x.dtype,
                  vmem_limit_bytes=vmem_limit_bytes)                    # (B, T, d_out)
    # TODO(synk): training-mode dropout on attention weights not implemented (p=0.0 used).
    return out


def _reference(x, wq, wk, wv, wo, bo, num_heads):
    """Pure-JAX reference mirroring the PyTorch forward (dropout p=0)."""
    B, T, d_in = x.shape
    d_out = wq.shape[1]
    hd = d_out // num_heads
    q = (x @ wq).reshape(B, T, num_heads, hd).transpose(0, 2, 1, 3)
    k = (x @ wk).reshape(B, T, num_heads, hd).transpose(0, 2, 1, 3)
    v = (x @ wv).reshape(B, T, num_heads, hd).transpose(0, 2, 1, 3)
    s = jnp.einsum("bhqd,bhkd->bhqk", q, k)
    mask = jnp.triu(jnp.ones((T, T), bool), k=1)
    s = jnp.where(mask, -jnp.inf, s)
    w = jax.nn.softmax(s / (hd ** 0.5), axis=-1)
    ctx = jnp.einsum("bhqk,bhkd->bhqd", w, v).transpose(0, 2, 1, 3).reshape(B, T, d_out)
    return ctx @ wo + bo


if __name__ == "__main__":
    # Small shapes consistent with the module (context_length = T, dropout = 0.0).
    B, T = 2, 8
    d_in, d_out = 16, 32
    num_heads = 4

    key = jax.random.PRNGKey(0)
    kx, kq, kk_, kv_, ko, kb = jax.random.split(key, 6)

    x = jax.random.normal(kx, (B, T, d_in), dtype=jnp.float32)
    wq = jax.random.normal(kq, (d_in, d_out), dtype=jnp.float32) * 0.1
    wk = jax.random.normal(kk_, (d_in, d_out), dtype=jnp.float32) * 0.1
    wv = jax.random.normal(kv_, (d_in, d_out), dtype=jnp.float32) * 0.1
    wo = jax.random.normal(ko, (d_out, d_out), dtype=jnp.float32) * 0.1
    bo = jax.random.normal(kb, (1, d_out), dtype=jnp.float32) * 0.1

    ref = _reference(x, wq, wk, wv, wo, bo, num_heads)

    # f32 path (tight check against the reference).
    out_f32 = multi_head_attention(x, wq, wk, wv, wo, bo, num_heads=num_heads,
                                   compute_dtype=jnp.float32)
    out_f32 = jax.block_until_ready(out_f32)
    assert out_f32.shape == (B, T, d_out)
    assert jnp.allclose(out_f32, ref, atol=1e-4, rtol=1e-4), "f32 kernel mismatch vs reference"

    # Default bf16 MXU path (f32 accumulation / f32 softmax), loose check.
    out_bf16 = multi_head_attention(x, wq, wk, wv, wo, bo, num_heads=num_heads,
                                    approx_recip=True)
    out_bf16 = jax.block_until_ready(out_bf16)
    assert out_bf16.shape == (B, T, d_out)
    assert jnp.allclose(out_bf16, ref, atol=5e-2, rtol=5e-2), "bf16 kernel mismatch vs reference"

    print("KERNEL_OK")
</pallas_src>

<mosaic_0001>
module attributes {stable_mosaic.version = 11 : i64} {
  func.func @_linear_nobias_kernel(%arg0: i32, %arg1: i32, %arg2: i32, %arg3: memref<1x8x16xf32, #tpu.memory_space<vmem>>, %arg4: memref<16x96xf32, #tpu.memory_space<vmem>>, %arg5: memref<1x8x96xf32, #tpu.memory_space<vmem>>) attributes {dimension_semantics = [#tpu.dimension_semantics<parallel>, #tpu.dimension_semantics<parallel>, #tpu.dimension_semantics<parallel>], iteration_bounds = array<i64: 2, 1, 1>, scalar_prefetch = 0 : i64, scratch_operands = 0 : i64, tpu.core_type = #tpu.core_type<tc>, window_params = [{transform_indices = @transform_0, window_bounds = array<i64: 1, 8, 16>}, {transform_indices = @transform_1, window_bounds = array<i64: 16, 96>}, {transform_indices = @transform_2, window_bounds = array<i64: 1, 8, 96>}]} {
    %c0 = arith.constant 0 : index
    %c0_0 = arith.constant 0 : index
    %c0_1 = arith.constant 0 : index
    %0 = vector.load %arg3[%c0, %c0_0, %c0_1] : memref<1x8x16xf32, #tpu.memory_space<vmem>>, vector<1x8x16xf32>
    %1 = vector.shape_cast %0 : vector<1x8x16xf32> to vector<8x16xf32>
    %c0_2 = arith.constant 0 : index
    %c0_3 = arith.constant 0 : index
    %2 = vector.load %arg4[%c0_2, %c0_3] : memref<16x96xf32, #tpu.memory_space<vmem>>, vector<16x96xf32>
    %cst = arith.constant dense<0.000000e+00> : vector<8x96xf32>
    %3 = tpu.matmul %1, %2, %cst {dimension_numbers = #tpu.dot_dimension_numbers<[1], [0], [0], [1], [0, 0, 1, 1], [], []>} : vector<8x16xf32>, vector<16x96xf32>, vector<8x96xf32> -> vector<8x96xf32>
    %c0_4 = arith.constant 0 : index
    %c0_5 = arith.constant 0 : index
    %c0_6 = arith.constant 0 : index
    %4 = vector.load %arg5[%c0_4, %c0_5, %c0_6] : memref<1x8x96xf32, #tpu.memory_space<vmem>>, vector<1x8x96xf32>
    %5 = vector.shape_cast %4 : vector<1x8x96xf32> to vector<8x96xf32>
    %6 = vector.shape_cast %3 : vector<8x96xf32> to vector<1x8x96xf32>
    tpu.vector_store %arg5[%c0_4, %c0_5, %c0_6], %6 {strides = array<i32>} : memref<1x8x96xf32, #tpu.memory_space<vmem>>, vector<1x8x96xf32>,
    return
  }
  func.func @transform_0(%arg0: i32, %arg1: i32, %arg2: i32) -> (i32, i32, i32) {
    %c0_i32 = arith.constant 0 : i32
    %c0_i32_0 = arith.constant 0 : i32
    return %arg0, %arg1, %c0_i32 : i32, i32, i32
  }
  func.func @transform_1(%arg0: i32, %arg1: i32, %arg2: i32) -> (i32, i32) {
    %c0_i32 = arith.constant 0 : i32
    %c0_i32_0 = arith.constant 0 : i32
    return %c0_i32, %arg2 : i32, i32
  }
  func.func @transform_2(%arg0: i32, %arg1: i32, %arg2: i32) -> (i32, i32, i32) {
    %c0_i32 = arith.constant 0 : i32
    return %arg0, %arg1, %arg2 : i32, i32, i32
  }
}

</mosaic_0001>

<bundles_post_ra>
// kernel: tpu_custom_call.1
= control target key start
LH: loop header
LB: loop body
LE: loop exit
PB: predicated region body
PF: predicated region fallthrough
CT: control target
= control target key end

     0   :  { %7 = vsyncpa [#allocation3], 0  ;;  %s888_s0 = inlined_call_operand.hbm [shape: f32[2,8,16], index: 0, kind: input, shape index: {}]   ;;  %s889_s1 = inlined_call_operand.hbm [shape: f32[16,96], index: 1, kind: input, shape index: {}]   ;;  %s890_s2 = inlined_call_operand.hbm [shape: f32[2,8,96], index: 2, kind: output, shape index: {}]  }
   0x1   :  { %9 = vsyncpa [#allocation3 + $0x1], 0 }
   0x2   :  { %10 = vsyncpa [#allocation6], 0 }
   0x3   :  { %11 = vsyncpa [#allocation4], 0 }
   0x4   :  { %13 = vsyncpa [#allocation4 + $0x1], 0  ;;  %s674_s9 = smov 0   ;;  %s676_s10 = smov 0  }
   0x5   :  { %s678_s11 = smov 0   ;;  %s680_s12 = smov 0  }
   0x6   :  { %s682_s13 = smov 0   ;;  %s684_s14 = smov 0  }
   0x7 LB: > { %s398_s15 = sadd.s32 4294967295, %s649_s14   ;;  %s399_s16 = sadd.s32 4294967294, %s649_s14   ;;  %s649_s14 = sphi %s684_s14, %s19_s14   ;;  %s645_s13 = sphi %s682_s13, %s914_s13   ;;  %s641_s12 = sphi %s680_s12, %s913_s12   ;;  %s637_s11 = sphi %s678_s11, %s912_s11   ;;  %s633_s10 = sphi %s676_s10, %s911_s10   ;;  %s629_s9 = sphi %s674_s9, %s910_s9  }
   0x8   : > { %p60_p0 = scmp.ne.s32.totalorder %s633_s10, %s629_s9  ;;  %p708_p1 = scmp.eq.s32.totalorder %s398_s15, 0 }
   0x9   : > { %p712_p2 = scmp.eq.s32.totalorder %s398_s15, 1  ;;  %p120_p3 = scmp.eq.s32.totalorder %s399_s16, 1 }
   0xa   : > { %s895_s17 = scalar_select %p708_p1, 1, 0 }
   0xb   : > { %s896_s18 = scalar_select %p712_p2, 1, 0 }
   0xc   : > { %p718_p4 = por %p708_p1, %p60_p0  ;;  %p400_p5 = scmp.ge.s32.totalorder %s649_s14, 1 }
   0xd   : > { %p723_p6 = por %p120_p3, %p60_p0  ;;  %p127_p7 = scmp.lt.s32.totalorder %s649_s14, 3 }
   0xe   : > { %s897_s19 = scalar_select %p718_p4, 1, 0 }
   0xf   : > { %s898_s20 = scalar_select %p723_p6, 1, 0 }
  0x10   : > { %p728_p8 = pnand %p400_p5, %p127_p7  ;;  %s651_s22 = smov [#allocation5]  }
  0x11   : > { %s141_s23 = sshll.u32 %s651_s22, 4  ;;  %s38_s25 = sadd.s32 1, %s645_s13  ;;  %s142_s23 = int_to_ptr.vmem [resolvable:$true] %s141_s23 }
  0x12   : > { %s899_s21 = scalar_select %p728_p8, 1, 0 }
  0x13   : > { %p435_p9 = pneg %p728_p8  ;;  %s505_s28 = scalar_lea.hbm %s889_s1, 256 }
  0x14   : > { %p506_p12 = scmp.ne.s32.totalorder %s889_s1, %s505_s28  ;;  %p512_p5 = scmp.lt.u32.totalorder %s505_s28, %s889_s1 }
  0x15   : > { %p737_p11 = pnand %p435_p9, %p708_p1 }
  0x17   : > { %p507_p13 = pneg %p737_p11 }
  0x19   : > { %p508_p0 = pnand %p507_p13, %p506_p12 }
  0x1b   : > { %p509_p3 = pneg %p508_p0 }
  0x1d   : > { %p514_p7 = pnand %p512_p5, %p509_p3 }
  0x1f   : > { %517 = shalt.err (!%p514_p7)
}
  0x20   : > { %s518_s5 = scalar_lea.vmem %s142_s23, 256  ;;  %p526_p1 = scmp.lt.s32.totalorder %s142_s23, %s142_s23 }
  0x21   : > { %p519_p9 = scmp.ne.s32.totalorder %s142_s23, %s518_s5  ;;  %p527_p4 = scmp.lt.s32.totalorder %s518_s5, %s518_s5 }
  0x23   : > { %p521_p10 = pnand %p519_p9, %p507_p13  ;;  %p528_p8 = por %p527_p4, %p526_p1 }
  0x25   : > { %p522_p6 = pneg %p521_p10 }
  0x27   : > { %p529_p2 = pnand %p528_p8, %p522_p6 }
  0x29   : > { %532 = shalt.err (!%p529_p2)
}
  0x2a   : > { %s652_s6 = smov 128   ;;  %s653_s7 = smov 8  }
  0x2b   : > { %438 = dma.hbm_to_vmem [thread:$0]  (!%p737_p11), %s889_s1, 256, %s142_s23, [#allocation6], %s652_s6, %s652_s6, %s653_s7  }
  0x2c   : > { %p40_p1 = scmp.ge.s32.totalorder %s38_s25, 2  ;;  %s47_s16 = sadd.s32 1, %s637_s11 }
  0x2d   : > { %p54_p2 = scmp.ne.s32.totalorder %s637_s11, %s633_s10  ;;  %p55_p4 = scmp.eq.s32.totalorder %s649_s14, 0 }
  0x2e   : > { %s916_s25 = smov (%p40_p1, %s38_s25), 0  ;;  %p902_p8 = scmp.ne.s32.totalorder %s896_s18, 0 }
  0x2f   : > { %p764_p6 = por %p55_p4, %p54_p2  ;;  %s42_s24 = ssub.s32 %s645_s13, %s916_s25 }
  0x30   : > { %p770_p10 = por %p902_p8, %p54_p2  ;;  %p448_p12 = scmp.lt.s32.totalorder %s649_s14, 2 }
  0x31   : > { %p45_p11 = scmp.eq.s32.totalorder %s42_s24, 0  ;;  %s155_s23 = sand.u32 1, %s637_s11  }
  0x32   : > { %s403_s27 = sshll.u32 %s155_s23, 3  ;;  %s404_s29 = sshll.u32 %s645_s13, 7 }
  0x33   : > { %s779_s28 = scalar_select %p45_p11, %s637_s11, %s47_s16  }
  0x34   : > { %s785_s4 = scalar_lea.hbm %s888_s0, %s404_s29  ;;  %s159_s18 = scalar_lea.vmem [#allocation2], %s403_s27 }
  0x35   : > { %s167_s5 = sshll.u32 %s159_s18, 4  ;;  %p791_p13 = pnand %p448_p12, %p764_p6  ;;  %s787_s5 = int_to_ptr.vmem [resolvable:$true] %s167_s5 }
  0x36   : > { %s156_s7 = scalar_lea.sflag [#allocation3], %s155_s23  ;;  %s533_s8 = scalar_lea.hbm %s785_s4, 128 }
  0x37   : > { %p534_p0 = scmp.ne.s32.totalorder %s785_s4, %s533_s8  ;;  %p535_p3 = pneg %p791_p13 }
  0x38   : > { %s538_s24 = scalar_lea.hbm %s888_s0, 256  ;;  %p539_p9 = scmp.lt.u32.totalorder %s785_s4, %s888_s0 }
  0x39   : > { %p536_p5 = pnand %p535_p3, %p534_p0  ;;  %p540_p1 = scmp.lt.u32.totalorder %s538_s24, %s533_s8 }
  0x3a   : > { %p542_p4 = scmp.lt.u32.totalorder %s533_s8, %s785_s4 }
  0x3b   : > { %p537_p7 = pneg %p536_p5  ;;  %p541_p2 = por %p540_p1, %p539_p9 }
  0x3d   : > { %p543_p6 = por %p542_p4, %p541_p2 }
  0x3f   : > { %p544_p8 = pnand %p543_p6, %p537_p7 }
  0x41   : > { %547 = shalt.err (!%p544_p8)
}
  0x42   : > { %s548_s23 = scalar_lea.vmem %s787_s5, 128  ;;  %s654_s29 = smov [#allocation2]  }
  0x43   : > { %p549_p12 = scmp.ne.s32.totalorder %s787_s5, %s548_s23  ;;  %s553_s30 = sshll.u32 %s654_s29, 4  ;;  %s554_s30 = int_to_ptr.vmem [resolvable:$false] %s553_s30 }
  0x44   : > { %s555_s3 = scalar_lea.vmem %s554_s30, 256  ;;  %p556_p5 = scmp.lt.s32.totalorder %s787_s5, %s554_s30 }
  0x45   : > { %p551_p11 = pnand %p549_p12, %p535_p3  ;;  %p557_p9 = scmp.lt.s32.totalorder %s555_s3, %s548_s23 }
  0x47   : > { %p552_p0 = pneg %p551_p11  ;;  %p558_p1 = por %p557_p9, %p556_p5 }
  0x49   : > { %p559_p2 = pnand %p558_p1, %p552_p0 }
  0x4b   : > { %562 = shalt.err (!%p559_p2)
}
  0x4c   : > { %442 = dma.hbm_to_vmem [thread:$0]  (!%p791_p13), %s785_s4, 128, %s787_s5, %s156_s7  }
  0x4d   : > { %p905_p7 = scmp.ne.s32.totalorder %s899_s21, 0 }
  0x4e   : > { %s823_s18 = sand.u32 (!%p905_p7), 1, %s633_s10   ;;  %p906_p3 = scmp.ne.s32.totalorder (!%p905_p7), %s897_s19, 0 }
  0x4f   : > { %176 = sbr.rel (%p905_p7) target bundleno = 323 (0x143), region = 28  ;;  %s406_s8 = sshll.u32 (!%p905_p7), %s823_s18, 3 }
  0x50   : > { %s179_s15 = scalar_lea.sflag (!%p905_p7), [#allocation3], %s823_s18  ;;  %s182_s16 = scalar_lea.vmem (!%p905_p7), [#allocation2], %s406_s8 }
  0x56   : > { %616 = dma.done.wait (%p906_p3), %s179_s15, 128  }
  0x57   : > { %618 = vsyncadd (%p906_p3), %s179_s15, 4294967168  ;;  %p907_p4 = scmp.ne.s32.totalorder %s895_s17, 0 }
  0x59   : > { %620 = dma.done.wait (%p907_p4), [#allocation6], 256  }
  0x5a   : > { %622 = vsyncadd (%p907_p4), [#allocation6], 4294967040  ;;  %v655_v0 = vmov 0.0|0.0   ;;  %vm656_vm0 = vmmov 0   ;;  %v657_v1 = vmov 0.0   ;;  %v208_v2 = vld [vmem:[#allocation5] sm:$0xff] }
  0x5b   : > { %424 = vmatprep.subr.bf16.mxu0 %v655_v0  ;;  %421 = vmatprep.mubr.msk.f32.mxu0 %vm656_vm0, %v657_v1  ;;  %v209_v3 = vld [vmem:[#allocation5 + $0x8] sm:$0xff]  ;;  %v207_v5 = vld [vmem:[%s182_s16] sm:$0xff]  ;;  %vm210_vm1 = vcmask 130048   ;;  %s411_s19 = sshll.u32 %s641_s12, 7  ;;  %s206_s21 = scalar_lea.vmem [#allocation7], %s406_s8  ;;  %vm284_vm2 = vcmask 785408  }
  0x5c   : > { %v425_v4 = vpack.c.bf16 %v209_v3, %v208_v2  ;;  %s302_s4 = sshll.u32 %s206_s21, 4  ;;  %s839_s6 = scalar_lea.hbm %s890_s2, %s411_s19  ;;  %s841_s4 = int_to_ptr.vmem [resolvable:$true] %s302_s4 }
  0x5d   : > { %s287_s7 = scalar_lea.sflag [#allocation4], %s823_s18  ;;  %s563_s24 = scalar_lea.vmem %s841_s4, 128 }
  0x5e   : > { %426 = vmatpush3.bf16.msra.mxu0 %v425_v4  ;;  %p564_p13 = scmp.ne.s32.totalorder %s841_s4, %s563_s24  ;;  %s658_s12 = smov [#allocation7]  }
  0x5f   : > { %s567_s22 = sshll.u32 %s658_s12, 4  ;;  %s568_s22 = int_to_ptr.vmem [resolvable:$false] %s567_s22 }
  0x60   : > { %p565_p6 = pnand %p564_p13, %p770_p10  ;;  %s569_s27 = scalar_lea.vmem %s568_s22, 256 }
  0x61   : > { %422 = vmatmul.mubr.msk.f32.vlgmr.msra.gmra.mrb[0].mxu0 %vm210_vm1, %v207_v5  ;;  %p570_p12 = scmp.lt.s32.totalorder %s841_s4, %s568_s22  ;;  %p571_p11 = scmp.lt.s32.totalorder %s569_s27, %s563_s24 }
  0x62   : > { %p566_p8 = pneg %p565_p6 }
  0x63   : > { %p572_p0 = por %p571_p11, %p570_p12 }
  0x65   : > { %p573_p5 = pnand %p572_p0, %p566_p8 }
 0x134   : > { %v280_v6 = vpop.f32.mrb[0].mxu0 }
 0x135   : > { %285 = vst.msk [vmem:[%s206_s21] sm:$0xff] %vm284_vm2, %v280_v6  ;;  %v423_v7 = vpop.f32.mrb[1].mxu0 }
 0x136   : > { %576 = shalt.err (!%p573_p5)
}
 0x137   : > { %s577_s23 = scalar_lea.hbm %s839_s6, 128  ;;  %s581_s3 = scalar_lea.hbm %s890_s2, 256 }
 0x138   : > { %p578_p9 = scmp.ne.s32.totalorder %s839_s6, %s577_s23  ;;  %p582_p7 = scmp.lt.u32.totalorder %s839_s6, %s890_s2 }
 0x139   : > { %p583_p3 = scmp.lt.u32.totalorder %s581_s3, %s577_s23  ;;  %p585_p13 = scmp.lt.u32.totalorder %s577_s23, %s839_s6 }
 0x13a   : > { %p579_p1 = pnand %p578_p9, %p770_p10 }
 0x13b   : > { %p584_p4 = por %p583_p3, %p582_p7 }
 0x13c   : > { %p580_p2 = pneg %p579_p1 }
 0x13d   : > { %p586_p6 = por %p585_p13, %p584_p4 }
 0x13f   : > { %p587_p8 = pnand %p586_p6, %p580_p2 }
 0x141   : > { %590 = shalt.err (!%p587_p8)
}
 0x142   : > { %433 = dma.vmem_to_hbm [thread:$0]  (%p770_p10), %s841_s4, 128, %s839_s6, %s287_s7  }
 0x143 PF: > { %s314_s15 = sand.u32 1, %s629_s9   ;;  %p908_p12 = scmp.ne.s32.totalorder %s898_s20, 0 }
 0x144   : > { %p909_p11 = scmp.ge.s32.totalorder %s649_s14, 2  ;;  %s315_s16 = scalar_lea.sflag [#allocation4], %s314_s15 }
 0x146   : > { %p444_p0 = pnand %p909_p11, %p908_p12 }
 0x148   : > { %624 = dma.done.wait (!%p444_p0), %s315_s16, 128  }
 0x149   : > { %626 = vsyncadd (!%p444_p0), %s315_s16, 4294967168  ;;  %s19_s14 = sadd.s32 1, %s649_s14   ;;  %s910_s9 = smov %s633_s10 }
 0x14a   : > { %p16_p5 = scmp.ge.s32.totalorder %s19_s14, 4   ;;  %s911_s10 = smov %s637_s11 }
 0x14b   : > { %s912_s11 = smov %s779_s28  ;;  %s913_s12 = smov %s645_s13 }
 0x14c   : > { %s914_s13 = smov %s916_s25  ;;  %18 = sbr.rel (!%p16_p5) target bundleno = 7 (0x7), region = 78 }
 0x153   :  { %320 = vsyncpa [#allocation3], 1 }
 0x154   :  { %322 = vsyncpa [#allocation3 + $0x1], 1 }
 0x155   :  { %323 = vsyncpa [#allocation6], 1 }
 0x156   :  { %324 = vsyncpa [#allocation4], 1 }
 0x157   :  { %326 = vsyncpa [#allocation4 + $0x1], 1 }

</bundles_post_ra>
